<compile_context>
chip_gen: v7x
topology: tpu7x:2x2x1
jax: 0.10.0
libtpu: 0.0.40
codegen_flags: <defaults>
</compile_context>

<pallas_src>
import functools

import jax
import jax.numpy as jnp
from jax.experimental import pallas as pl
from jax.experimental.pallas import tpu as pltpu

BN_EPS = 1e-5                    # nn.BatchNorm2d default eps
_MXU_DTYPE = jnp.bfloat16        # MXU operand dtype; accumulation is always f32
_PMAX = 2                        # unified spatial padding (max pad over conv1/conv2/conv3)


# ----------------------------------------------------------------------------
# Fused Block4 kernel: one grid step == one image of the batch
# ----------------------------------------------------------------------------
def _block4_fused_kernel(x_ref, mask_ref, w1_ref, w2_ref, w3_ref, w4_ref, b_ref,
                         o_ref, *, H, W):
    """Whole Block4 chain for one image, channels on sublanes / pixels on lanes.

    x_ref    : (1, C0p, Hp*Wp)  upcat in padded-flat layout (pad=_PMAX), bf16
    mask_ref : (1, Ls)          1.0 at valid pixels of the output span, 0.0 at gaps, f32
    w1_ref   : (C1, 9*C0p)      conv1 weights, BN folded, tap-major column blocks, bf16
    w2_ref   : (C1, 9*C1)       conv2 (3x3, dil 2) fused weights, bf16
    w3_ref   : (C1, 4*C1)       conv3 (2x2, dil 2) fused weights, bf16
    w4_ref   : (C1, 3*C1)       conv4 (1x1) weights over [cat1|cat2|cat3], bf16
    b_ref    : (4, C1, 1)       folded biases (conv1..conv4), f32
    o_ref    : (1, C1, H*Wp)    lane-dense output slab (Wp-wide rows; wrapper crops), f32
    """
    f32 = jnp.float32
    C1 = o_ref.shape[1]
    Wp = W + 2 * _PMAX
    Hp = H + 2 * _PMAX
    Lt = Hp * Wp                      # padded-flat length
    q0 = _PMAX * Wp + _PMAX           # flat index of output pixel (0, 0)
    Ls = (H - 1) * Wp + W             # span covering all valid output pixels

    mask = mask_ref[...]              # (1, Ls) f32

    def conv(src_pf, w_ref, bias, ks, dil, pad):
        """src_pf: (Cin, Lt) f32 padded-flat. Returns (C1, Ls) f32 span output.

        Every tap of the (dilated) conv is a static lane slice of the padded-flat
        map; the taps are stacked on sublanes and contracted in a single MXU dot.
        """
        wins = []
        for ki in range(ks):
            for kj in range(ks):
                s = q0 + (ki * dil - pad) * Wp + (kj * dil - pad)   # always in-bounds
                wins.append(src_pf[:, s:s + Ls])
        stack = jnp.concatenate(wins, axis=0) if len(wins) > 1 else wins[0]
        return jnp.dot(w_ref[...], stack.astype(_MXU_DTYPE),
                       preferred_element_type=f32) + bias

    def to_padded_flat(span):
        """(C, Ls) masked span -> (C, Lt) padded-flat map with zero halo."""
        c = span.shape[0]
        return jnp.concatenate(
            [jnp.zeros((c, q0), span.dtype),
             span,
             jnp.zeros((c, Lt - q0 - Ls), span.dtype)], axis=1)

    x_pf = x_ref[0].astype(f32)                                  # (C0p, Lt)

    # conv1: 3x3, dil 1, pad 1 (BN + bias folded; LeakyReLU(1.0) == identity)
    cat1 = conv(x_pf, w1_ref, b_ref[0], 3, 1, 1) * mask          # (C1, Ls) f32
    # conv2: 3x3, dil 2, pad 2
    cat2 = conv(to_padded_flat(cat1), w2_ref, b_ref[1], 3, 2, 2) * mask
    # conv3: 2x2, dil 2, pad 1
    cat3 = conv(to_padded_flat(cat2), w3_ref, b_ref[2], 2, 2, 1)

    # conv4: 1x1 over concat([cat1, cat2, cat3]) -> one dot, concat never hits HBM
    cat = jnp.concatenate([cat1, cat2, cat3], axis=0).astype(_MXU_DTYPE)  # (3*C1, Ls)
    out = jnp.dot(w4_ref[...], cat, preferred_element_type=f32) + b_ref[3]

    # Lane-dense store: pad the span tail so each image row occupies Wp lanes;
    # the wrapper crops the Wp-W junk columns with a cheap XLA slice.
    o_ref[0] = jnp.concatenate(
        [out, jnp.zeros((C1, Wp - W), f32)], axis=1).astype(o_ref.dtype)


# ----------------------------------------------------------------------------
# Plain-JAX glue: pixel shuffle, BN folding, weight re-layout
# ----------------------------------------------------------------------------
def pixel_shuffle_nchw(x, r):
    n, c, h, w = x.shape
    co = c // (r * r)
    x = x.reshape(n, co, r, r, h, w)
    x = x.transpose(0, 1, 4, 2, 5, 3)                            # (n, co, h, r, w, r)
    return x.reshape(n, co, h * r, w * r)


def _fold_bn(w, b, bn):
    """Fold inference-mode BatchNorm into conv weight/bias (exact in f32)."""
    gamma, beta, mean, var = bn
    scale = gamma * jax.lax.rsqrt(var + BN_EPS)                  # (Cout,)
    w_f = w * scale[:, None, None, None]                         # (Cout, Cin, KH, KW)
    b_f = (b - mean) * scale + beta
    return w_f, b_f


def _fuse_weight(w, cin_pad=None):
    """(Cout, Cin, KH, KW) -> (Cout, KH*KW*Cin_pad), tap-major blocks of Cin_pad cols."""
    cout, cin, kh, kw = w.shape
    wt = jnp.transpose(w, (0, 2, 3, 1))                          # (Cout, KH, KW, Cin)
    if cin_pad is not None and cin_pad > cin:
        wt = jnp.pad(wt, ((0, 0), (0, 0), (0, 0), (0, cin_pad - cin)))
        cin = cin_pad
    return wt.reshape(cout, kh * kw * cin).astype(_MXU_DTYPE)


# ----------------------------------------------------------------------------
# Block4 forward (NCHW in / NCHW out)
# ----------------------------------------------------------------------------
def block4_forward(params, x, skip, upscale=2):
    x = pixel_shuffle_nchw(x, upscale)                           # (N, Cin/r^2, rH, rW)
    # TODO(synk): Dropout2d is eval-mode identity here (stochastic channel drop not modeled).
    upcat = jnp.concatenate([x, skip], axis=1)                   # (N, C0, H, W)
    n, c0, H, W = upcat.shape

    Wp, Hp = W + 2 * _PMAX, H + 2 * _PMAX
    Lt, q0 = Hp * Wp, _PMAX * Wp + _PMAX
    Ls = (H - 1) * Wp + W
    c0p = ((c0 + 7) // 8) * 8                                    # sublane-aligned channels

    # Lane-dense HBM layout: channel-padded + spatially pre-padded + flattened, bf16.
    up = jnp.pad(upcat, ((0, 0), (0, c0p - c0), (_PMAX, _PMAX), (_PMAX, _PMAX)))
    x_pf = up.reshape(n, c0p, Lt).astype(_MXU_DTYPE)             # (N, C0p, Hp*Wp)

    # Valid-pixel mask over the output span (zeros at the inter-row gap columns).
    col = (q0 + jnp.arange(Ls, dtype=jnp.int32)) % Wp
    mask = ((col >= _PMAX) & (col < _PMAX + W)).astype(jnp.float32).reshape(1, Ls)

    # Fold BN + bias into each conv (in f32), then re-layout weights for the fused dots.
    w1, b1 = _fold_bn(params['w1'], params['b1'], params['bn1'])
    w2, b2 = _fold_bn(params['w2'], params['b2'], params['bn2'])
    w3, b3 = _fold_bn(params['w3'], params['b3'], params['bn3'])
    w4, b4 = _fold_bn(params['w4'], params['b4'], params['bn4'])
    c1 = w1.shape[0]

    w1f = _fuse_weight(w1, c0p)                                  # (C1, 9*C0p)
    w2f = _fuse_weight(w2)                                       # (C1, 9*C1)
    w3f = _fuse_weight(w3)                                       # (C1, 4*C1)
    w4f = w4[:, :, 0, 0].astype(_MXU_DTYPE)                      # (C1, 3*C1)
    b_all = jnp.stack([b1, b2, b3, b4]).reshape(4, c1, 1).astype(jnp.float32)

    kern = functools.partial(_block4_fused_kernel, H=H, W=W)

    # Per-image blocks are KiB-scale, so the default scoped-VMEM budget is ample on
    # v5e/v6e/v7x; no vmem_limit override. grid=(N,) is "parallel" so v7x's two TCs
    # split the batch.
    # TODO(synk): row-tile grid axis (4-row halo) for large H*W; multi-image blocking
    #             per grid step for large N with tiny H*W.
    out_flat = pl.pallas_call(
        kern,
        out_shape=jax.ShapeDtypeStruct((n, c1, H * Wp), jnp.float32),
        grid=(n,),
        in_specs=[
            pl.BlockSpec((1, c0p, Lt), lambda b: (b, 0, 0)),
            pl.BlockSpec((1, Ls), lambda b: (0, 0)),
            pl.BlockSpec((c1, 9 * c0p), lambda b: (0, 0)),
            pl.BlockSpec((c1, 9 * c1), lambda b: (0, 0)),
            pl.BlockSpec((c1, 4 * c1), lambda b: (0, 0)),
            pl.BlockSpec((c1, 3 * c1), lambda b: (0, 0)),
            pl.BlockSpec((4, c1, 1), lambda b: (0, 0, 0)),
        ],
        out_specs=pl.BlockSpec((1, c1, H * Wp), lambda b: (b, 0, 0)),
        compiler_params=pltpu.CompilerParams(
            dimension_semantics=("parallel",),
        ),
    )(x_pf, mask, w1f, w2f, w3f, w4f, b_all)

    # (N, C1, H, Wp) slab -> crop the Wp-W junk columns -> NCHW.
    # TODO(synk): trailing Dropout2d also eval-mode identity.
    return out_flat.reshape(n, c1, H, Wp)[:, :, :, :W]


# ----------------------------------------------------------------------------
# Pure-JAX (XLA) reference with the module's literal eval-mode math, all f32
# ----------------------------------------------------------------------------
def _block4_reference(params, x, skip, upscale=2):
    x = pixel_shuffle_nchw(x, upscale)
    h = jnp.concatenate([x, skip], axis=1)                       # Dropout2d == identity (eval)

    def conv_act_bn(h, w, b, bn, dil, pad):
        y = jax.lax.conv_general_dilated(
            h, w, window_strides=(1, 1), padding=[(pad, pad), (pad, pad)],
            rhs_dilation=(dil, dil),
            dimension_numbers=('NCHW', 'OIHW', 'NCHW'))
        y = y + b[None, :, None, None]
        # nn.LeakyReLU(True): negative_slope == 1.0 -> identity.
        gamma, beta, mean, var = bn
        inv = jax.lax.rsqrt(var + BN_EPS)
        return ((y - mean[None, :, None, None]) * (gamma * inv)[None, :, None, None]
                + beta[None, :, None, None])

    cat1 = conv_act_bn(h,    params['w1'], params['b1'], params['bn1'], 1, 1)
    cat2 = conv_act_bn(cat1, params['w2'], params['b2'], params['bn2'], 2, 2)
    cat3 = conv_act_bn(cat2, params['w3'], params['b3'], params['bn3'], 2, 1)
    cat = jnp.concatenate([cat1, cat2, cat3], axis=1)
    return conv_act_bn(cat, params['w4'], params['b4'], params['bn4'], 1, 0)


# ----------------------------------------------------------------------------
# Parameter construction (deterministic, synthetic)
# ----------------------------------------------------------------------------
def init_block4_params(key, in_channels, out_channels, skip_channels, upscale=2):
    cin1 = in_channels // (upscale ** 2) + skip_channels
    counter = iter(range(10_000))

    def nk():                                    # fresh key per draw
        return jax.random.fold_in(key, next(counter))

    def conv(cout, cin, khw):
        w = 0.1 * jax.random.normal(nk(), (cout, cin) + khw, dtype=jnp.float32)
        b = 0.05 * jax.random.normal(nk(), (cout,), dtype=jnp.float32)
        return w, b

    def bn(cout):
        gamma = 1.0 + 0.1 * jax.random.normal(nk(), (cout,), dtype=jnp.float32)
        beta = 0.05 * jax.random.normal(nk(), (cout,), dtype=jnp.float32)
        mean = 0.1 * jax.random.normal(nk(), (cout,), dtype=jnp.float32)
        var = 1.0 + 0.1 * jax.random.uniform(nk(), (cout,), dtype=jnp.float32)
        return gamma, beta, mean, var

    p = {}
    p['w1'], p['b1'] = conv(out_channels, cin1, (3, 3))
    p['bn1'] = bn(out_channels)
    p['w2'], p['b2'] = conv(out_channels, out_channels, (3, 3))
    p['bn2'] = bn(out_channels)
    p['w3'], p['b3'] = conv(out_channels, out_channels, (2, 2))
    p['bn3'] = bn(out_channels)
    p['w4'], p['b4'] = conv(out_channels, 3 * out_channels, (1, 1))
    p['bn4'] = bn(out_channels)
    return p


# ----------------------------------------------------------------------------
if __name__ == "__main__":
    # Small shapes: in_channels=8, skip_channels=4, out_channels=8, upscale=2
    N, C_IN, H0, W0 = 2, 8, 8, 8
    SKIP_C, C_OUT, R = 4, 8, 2

    key = jax.random.PRNGKey(0)
    kx, ks, kp = jax.random.split(key, 3)
    x = jax.random.normal(kx, (N, C_IN, H0, W0), dtype=jnp.float32)             # NCHW
    skip = jax.random.normal(ks, (N, SKIP_C, R * H0, R * W0), dtype=jnp.float32)

    params = init_block4_params(kp, C_IN, C_OUT, SKIP_C, upscale=R)

    fwd = jax.jit(functools.partial(block4_forward, upscale=R))
    out = jax.block_until_ready(fwd(params, x, skip))

    assert out.shape == (N, C_OUT, R * H0, R * W0), out.shape
    assert bool(jnp.all(jnp.isfinite(out)))

    # Correctness vs. a pure-XLA f32 reference (loose tol: kernel feeds the MXU in bf16).
    ref = _block4_reference(params, x, skip, upscale=R)
    assert bool(jnp.allclose(out, ref, rtol=5e-2, atol=5e-2)), \
        float(jnp.max(jnp.abs(out - ref)))

    print("KERNEL_OK")
</pallas_src>

<mosaic_0001>
module attributes {stable_mosaic.version = 11 : i64} {
  func.func @_block4_fused_kernel(%arg0: i32, %arg1: memref<1x8x400xbf16, #tpu.memory_space<vmem>>, %arg2: memref<1x316xf32, #tpu.memory_space<vmem>>, %arg3: memref<8x72xbf16, #tpu.memory_space<vmem>>, %arg4: memref<8x72xbf16, #tpu.memory_space<vmem>>, %arg5: memref<8x32xbf16, #tpu.memory_space<vmem>>, %arg6: memref<8x24xbf16, #tpu.memory_space<vmem>>, %arg7: memref<4x8x1xf32, #tpu.memory_space<vmem>>, %arg8: memref<1x8x320xf32, #tpu.memory_space<vmem>>) attributes {dimension_semantics = [#tpu.dimension_semantics<parallel>], iteration_bounds = array<i64: 2>, scalar_prefetch = 0 : i64, scratch_operands = 0 : i64, tpu.core_type = #tpu.core_type<tc>, window_params = [{transform_indices = @transform_0, window_bounds = array<i64: 1, 8, 400>}, {pipeline_mode = #tpu.pipeline_mode<synchronous>, transform_indices = @transform_1, window_bounds = array<i64: 1, 316>}, {pipeline_mode = #tpu.pipeline_mode<synchronous>, transform_indices = @transform_2, window_bounds = array<i64: 8, 72>}, {pipeline_mode = #tpu.pipeline_mode<synchronous>, transform_indices = @transform_3, window_bounds = array<i64: 8, 72>}, {pipeline_mode = #tpu.pipeline_mode<synchronous>, transform_indices = @transform_4, window_bounds = array<i64: 8, 32>}, {pipeline_mode = #tpu.pipeline_mode<synchronous>, transform_indices = @transform_5, window_bounds = array<i64: 8, 24>}, {pipeline_mode = #tpu.pipeline_mode<synchronous>, transform_indices = @transform_6, window_bounds = array<i64: 4, 8, 1>}, {transform_indices = @transform_7, window_bounds = array<i64: 1, 8, 320>}]} {
    %c0 = arith.constant 0 : index
    %c0_0 = arith.constant 0 : index
    %0 = vector.load %arg2[%c0, %c0_0] : memref<1x316xf32, #tpu.memory_space<vmem>>, vector<1x316xf32>
    %c0_1 = arith.constant 0 : index
    %c0_2 = arith.constant 0 : index
    %c0_3 = arith.constant 0 : index
    %1 = vector.load %arg1[%c0_1, %c0_2, %c0_3] : memref<1x8x400xbf16, #tpu.memory_space<vmem>>, vector<1x8x400xbf16>
    %2 = vector.shape_cast %1 : vector<1x8x400xbf16> to vector<8x400xbf16>
    %3 = arith.extf %2 : vector<8x400xbf16> to vector<8x400xf32>
    %c0_4 = arith.constant 0 : index
    %c0_5 = arith.constant 0 : index
    %c0_6 = arith.constant 0 : index
    %4 = vector.load %arg7[%c0_4, %c0_5, %c0_6] : memref<4x8x1xf32, #tpu.memory_space<vmem>>, vector<1x8x1xf32>
    %5 = vector.shape_cast %4 : vector<1x8x1xf32> to vector<8x1xf32>
    %6 = vector.extract_strided_slice %3 {offsets = [0, 21], sizes = [8, 316], strides = [1, 1]} : vector<8x400xf32> to vector<8x316xf32>
    %7 = vector.extract_strided_slice %3 {offsets = [0, 22], sizes = [8, 316], strides = [1, 1]} : vector<8x400xf32> to vector<8x316xf32>
    %8 = vector.extract_strided_slice %3 {offsets = [0, 23], sizes = [8, 316], strides = [1, 1]} : vector<8x400xf32> to vector<8x316xf32>
    %9 = vector.extract_strided_slice %3 {offsets = [0, 41], sizes = [8, 316], strides = [1, 1]} : vector<8x400xf32> to vector<8x316xf32>
    %10 = vector.extract_strided_slice %3 {offsets = [0, 42], sizes = [8, 316], strides = [1, 1]} : vector<8x400xf32> to vector<8x316xf32>
    %11 = vector.extract_strided_slice %3 {offsets = [0, 43], sizes = [8, 316], strides = [1, 1]} : vector<8x400xf32> to vector<8x316xf32>
    %12 = vector.extract_strided_slice %3 {offsets = [0, 61], sizes = [8, 316], strides = [1, 1]} : vector<8x400xf32> to vector<8x316xf32>
    %13 = vector.extract_strided_slice %3 {offsets = [0, 62], sizes = [8, 316], strides = [1, 1]} : vector<8x400xf32> to vector<8x316xf32>
    %14 = vector.extract_strided_slice %3 {offsets = [0, 63], sizes = [8, 316], strides = [1, 1]} : vector<8x400xf32> to vector<8x316xf32>
    %15 = tpu.concatenate %6, %7, %8, %9, %10, %11, %12, %13, %14 in 0 : vector<8x316xf32>, vector<8x316xf32>, vector<8x316xf32>, vector<8x316xf32>, vector<8x316xf32>, vector<8x316xf32>, vector<8x316xf32>, vector<8x316xf32>, vector<8x316xf32> -> vector<72x316xf32>
    %c0_7 = arith.constant 0 : index
    %c0_8 = arith.constant 0 : index
    %16 = vector.load %arg3[%c0_7, %c0_8] : memref<8x72xbf16, #tpu.memory_space<vmem>>, vector<8x72xbf16>
    %17 = arith.truncf %15 : vector<72x316xf32> to vector<72x316xbf16>
    %cst = arith.constant dense<0.000000e+00> : vector<8x316xf32>
    %18 = tpu.matmul %16, %17, %cst {dimension_numbers = #tpu.dot_dimension_numbers<[1], [0], [0], [1], [0, 0, 1, 1], [], []>} : vector<8x72xbf16>, vector<72x316xbf16>, vector<8x316xf32> -> vector<8x316xf32>
    %19 = vector.broadcast %5 : vector<8x1xf32> to vector<8x316xf32>
    %20 = arith.addf %18, %19 : vector<8x316xf32>
    %21 = vector.broadcast %0 : vector<1x316xf32> to vector<8x316xf32>
    %22 = arith.mulf %20, %21 : vector<8x316xf32>
    %cst_9 = arith.constant 0.000000e+00 : f32
    %23 = vector.broadcast %cst_9 : f32 to vector<8x42xf32>
    %cst_10 = arith.constant 0.000000e+00 : f32
    %24 = vector.broadcast %cst_10 : f32 to vector<8x42xf32>
    %25 = tpu.concatenate %23, %22, %24 in 1 : vector<8x42xf32>, vector<8x316xf32>, vector<8x42xf32> -> vector<8x400xf32>
    %c1 = arith.constant 1 : index
    %c0_11 = arith.constant 0 : index
    %c0_12 = arith.constant 0 : index
    %26 = vector.load %arg7[%c1, %c0_11, %c0_12] : memref<4x8x1xf32, #tpu.memory_space<vmem>>, vector<1x8x1xf32>
    %27 = vector.shape_cast %26 : vector<1x8x1xf32> to vector<8x1xf32>
    %28 = vector.extract_strided_slice %25 {offsets = [0, 0], sizes = [8, 316], strides = [1, 1]} : vector<8x400xf32> to vector<8x316xf32>
    %29 = vector.extract_strided_slice %25 {offsets = [0, 2], sizes = [8, 316], strides = [1, 1]} : vector<8x400xf32> to vector<8x316xf32>
    %30 = vector.extract_strided_slice %25 {offsets = [0, 4], sizes = [8, 316], strides = [1, 1]} : vector<8x400xf32> to vector<8x316xf32>
    %31 = vector.extract_strided_slice %25 {offsets = [0, 40], sizes = [8, 316], strides = [1, 1]} : vector<8x400xf32> to vector<8x316xf32>
    %32 = vector.extract_strided_slice %25 {offsets = [0, 42], sizes = [8, 316], strides = [1, 1]} : vector<8x400xf32> to vector<8x316xf32>
    %33 = vector.extract_strided_slice %25 {offsets = [0, 44], sizes = [8, 316], strides = [1, 1]} : vector<8x400xf32> to vector<8x316xf32>
    %34 = vector.extract_strided_slice %25 {offsets = [0, 80], sizes = [8, 316], strides = [1, 1]} : vector<8x400xf32> to vector<8x316xf32>
    %35 = vector.extract_strided_slice %25 {offsets = [0, 82], sizes = [8, 316], strides = [1, 1]} : vector<8x400xf32> to vector<8x316xf32>
    %36 = vector.extract_strided_slice %25 {offsets = [0, 84], sizes = [8, 316], strides = [1, 1]} : vector<8x400xf32> to vector<8x316xf32>
    %37 = tpu.concatenate %28, %29, %30, %31, %32, %33, %34, %35, %36 in 0 : vector<8x316xf32>, vector<8x316xf32>, vector<8x316xf32>, vector<8x316xf32>, vector<8x316xf32>, vector<8x316xf32>, vector<8x316xf32>, vector<8x316xf32>, vector<8x316xf32> -> vector<72x316xf32>
    %c0_13 = arith.constant 0 : index
    %c0_14 = arith.constant 0 : index
    %38 = vector.load %arg4[%c0_13, %c0_14] : memref<8x72xbf16, #tpu.memory_space<vmem>>, vector<8x72xbf16>
    %39 = arith.truncf %37 : vector<72x316xf32> to vector<72x316xbf16>
    %cst_15 = arith.constant dense<0.000000e+00> : vector<8x316xf32>
    %40 = tpu.matmul %38, %39, %cst_15 {dimension_numbers = #tpu.dot_dimension_numbers<[1], [0], [0], [1], [0, 0, 1, 1], [], []>} : vector<8x72xbf16>, vector<72x316xbf16>, vector<8x316xf32> -> vector<8x316xf32>
    %41 = vector.broadcast %27 : vector<8x1xf32> to vector<8x316xf32>
    %42 = arith.addf %40, %41 : vector<8x316xf32>
    %43 = vector.broadcast %0 : vector<1x316xf32> to vector<8x316xf32>
    %44 = arith.mulf %42, %43 : vector<8x316xf32>
    %cst_16 = arith.constant 0.000000e+00 : f32
    %45 = vector.broadcast %cst_16 : f32 to vector<8x42xf32>
    %cst_17 = arith.constant 0.000000e+00 : f32
    %46 = vector.broadcast %cst_17 : f32 to vector<8x42xf32>
    %47 = tpu.concatenate %45, %44, %46 in 1 : vector<8x42xf32>, vector<8x316xf32>, vector<8x42xf32> -> vector<8x400xf32>
    %c2 = arith.constant 2 : index
    %c0_18 = arith.constant 0 : index
    %c0_19 = arith.constant 0 : index
    %48 = vector.load %arg7[%c2, %c0_18, %c0_19] : memref<4x8x1xf32, #tpu.memory_space<vmem>>, vector<1x8x1xf32>
    %49 = vector.shape_cast %48 : vector<1x8x1xf32> to vector<8x1xf32>
    %50 = vector.extract_strided_slice %47 {offsets = [0, 21], sizes = [8, 316], strides = [1, 1]} : vector<8x400xf32> to vector<8x316xf32>
    %51 = vector.extract_strided_slice %47 {offsets = [0, 23], sizes = [8, 316], strides = [1, 1]} : vector<8x400xf32> to vector<8x316xf32>
    %52 = vector.extract_strided_slice %47 {offsets = [0, 61], sizes = [8, 316], strides = [1, 1]} : vector<8x400xf32> to vector<8x316xf32>
    %53 = vector.extract_strided_slice %47 {offsets = [0, 63], sizes = [8, 316], strides = [1, 1]} : vector<8x400xf32> to vector<8x316xf32>
    %54 = tpu.concatenate %50, %51, %52, %53 in 0 : vector<8x316xf32>, vector<8x316xf32>, vector<8x316xf32>, vector<8x316xf32> -> vector<32x316xf32>
    %c0_20 = arith.constant 0 : index
    %c0_21 = arith.constant 0 : index
    %55 = vector.load %arg5[%c0_20, %c0_21] : memref<8x32xbf16, #tpu.memory_space<vmem>>, vector<8x32xbf16>
    %56 = arith.truncf %54 : vector<32x316xf32> to vector<32x316xbf16>
    %cst_22 = arith.constant dense<0.000000e+00> : vector<8x316xf32>
    %57 = tpu.matmul %55, %56, %cst_22 {dimension_numbers = #tpu.dot_dimension_numbers<[1], [0], [0], [1], [0, 0, 1, 1], [], []>} : vector<8x32xbf16>, vector<32x316xbf16>, vector<8x316xf32> -> vector<8x316xf32>
    %58 = vector.broadcast %49 : vector<8x1xf32> to vector<8x316xf32>
    %59 = arith.addf %57, %58 : vector<8x316xf32>
    %60 = tpu.concatenate %22, %44, %59 in 0 : vector<8x316xf32>, vector<8x316xf32>, vector<8x316xf32> -> vector<24x316xf32>
    %61 = arith.truncf %60 : vector<24x316xf32> to vector<24x316xbf16>
    %c0_23 = arith.constant 0 : index
    %c0_24 = arith.constant 0 : index
    %62 = vector.load %arg6[%c0_23, %c0_24] : memref<8x24xbf16, #tpu.memory_space<vmem>>, vector<8x24xbf16>
    %cst_25 = arith.constant dense<0.000000e+00> : vector<8x316xf32>
    %63 = tpu.matmul %62, %61, %cst_25 {dimension_numbers = #tpu.dot_dimension_numbers<[1], [0], [0], [1], [0, 0, 1, 1], [], []>} : vector<8x24xbf16>, vector<24x316xbf16>, vector<8x316xf32> -> vector<8x316xf32>
    %c3 = arith.constant 3 : index
    %c0_26 = arith.constant 0 : index
    %c0_27 = arith.constant 0 : index
    %64 = vector.load %arg7[%c3, %c0_26, %c0_27] : memref<4x8x1xf32, #tpu.memory_space<vmem>>, vector<1x8x1xf32>
    %65 = vector.shape_cast %64 : vector<1x8x1xf32> to vector<8x1xf32>
    %66 = vector.broadcast %65 : vector<8x1xf32> to vector<8x316xf32>
    %67 = arith.addf %63, %66 : vector<8x316xf32>
    %cst_28 = arith.constant 0.000000e+00 : f32
    %68 = vector.broadcast %cst_28 : f32 to vector<8x4xf32>
    %69 = tpu.concatenate %67, %68 in 1 : vector<8x316xf32>, vector<8x4xf32> -> vector<8x320xf32>
    %c0_29 = arith.constant 0 : index
    %c0_30 = arith.constant 0 : index
    %c0_31 = arith.constant 0 : index
    %70 = vector.load %arg8[%c0_29, %c0_30, %c0_31] : memref<1x8x320xf32, #tpu.memory_space<vmem>>, vector<1x8x320xf32>
    %71 = vector.shape_cast %70 : vector<1x8x320xf32> to vector<8x320xf32>
    %72 = vector.shape_cast %69 : vector<8x320xf32> to vector<1x8x320xf32>
    tpu.vector_store %arg8[%c0_29, %c0_30, %c0_31], %72 {strides = array<i32>} : memref<1x8x320xf32, #tpu.memory_space<vmem>>, vector<1x8x320xf32>,
    return
  }
  func.func @transform_0(%arg0: i32) -> (i32, i32, i32) {
    %c0_i32 = arith.constant 0 : i32
    %c0_i32_0 = arith.constant 0 : i32
    %c0_i32_1 = arith.constant 0 : i32
    return %arg0, %c0_i32, %c0_i32_0 : i32, i32, i32
  }
  func.func @transform_1(%arg0: i32) -> (i32, i32) {
    %c0_i32 = arith.constant 0 : i32
    %c0_i32_0 = arith.constant 0 : i32
    %c0_i32_1 = arith.constant 0 : i32
    return %c0_i32, %c0_i32_0 : i32, i32
  }
  func.func @transform_2(%arg0: i32) -> (i32, i32) {
    %c0_i32 = arith.constant 0 : i32
    %c0_i32_0 = arith.constant 0 : i32
    %c0_i32_1 = arith.constant 0 : i32
    return %c0_i32, %c0_i32_0 : i32, i32
  }
  func.func @transform_3(%arg0: i32) -> (i32, i32) {
    %c0_i32 = arith.constant 0 : i32
    %c0_i32_0 = arith.constant 0 : i32
    %c0_i32_1 = arith.constant 0 : i32
    return %c0_i32, %c0_i32_0 : i32, i32
  }
  func.func @transform_4(%arg0: i32) -> (i32, i32) {
    %c0_i32 = arith.constant 0 : i32
    %c0_i32_0 = arith.constant 0 : i32
    %c0_i32_1 = arith.constant 0 : i32
    return %c0_i32, %c0_i32_0 : i32, i32
  }
  func.func @transform_5(%arg0: i32) -> (i32, i32) {
    %c0_i32 = arith.constant 0 : i32
    %c0_i32_0 = arith.constant 0 : i32
    %c0_i32_1 = arith.constant 0 : i32
    return %c0_i32, %c0_i32_0 : i32, i32
  }
  func.func @transform_6(%arg0: i32) -> (i32, i32, i32) {
    %c0_i32 = arith.constant 0 : i32
    %c0_i32_0 = arith.constant 0 : i32
    %c0_i32_1 = arith.constant 0 : i32
    %c0_i32_2 = arith.constant 0 : i32
    return %c0_i32, %c0_i32_0, %c0_i32_1 : i32, i32, i32
  }
  func.func @transform_7(%arg0: i32) -> (i32, i32, i32) {
    %c0_i32 = arith.constant 0 : i32
    %c0_i32_0 = arith.constant 0 : i32
    %c0_i32_1 = arith.constant 0 : i32
    return %arg0, %c0_i32, %c0_i32_0 : i32, i32, i32
  }
}

</mosaic_0001>

<bundles_post_ra>
// kernel: block4_forward.1
= control target key start
LH: loop header
LB: loop body
LE: loop exit
PB: predicated region body
PF: predicated region fallthrough
CT: control target
= control target key end

     0   :  { %s1487_s24 = smov 0   ;;  %s1755_s0 = inlined_call_operand.vmem [shape: bf16[2,8,400], index: 0, kind: input, shape index: {}]   ;;  %s1756_s1 = inlined_call_operand.vmem [shape: f32[1,316], index: 1, kind: input, shape index: {}]   ;;  %s1757_s2 = inlined_call_operand.vmem [shape: bf16[8,72], index: 2, kind: input, shape index: {}]   ;;  %s1758_s3 = inlined_call_operand.vmem [shape: bf16[8,72], index: 3, kind: input, shape index: {}]   ;;  %s1759_s4 = inlined_call_operand.vmem [shape: bf16[8,32], index: 4, kind: input, shape index: {}]   ;;  %s1760_s5 = inlined_call_operand.vmem [shape: bf16[8,24], index: 5, kind: input, shape index: {}]   ;;  %s1761_s6 = inlined_call_operand.vmem [shape: f32[4,8,1], index: 6, kind: input, shape index: {}]   ;;  %s1762_s7 = inlined_call_operand.vmem [shape: f32[2,8,320], index: 7, kind: output, shape index: {}]  }
   0x1 LB: > { %s1178_s25 = sadd.s32 4294967295, %s1427_s24   ;;  %p1182_p0 = scmp.ge.s32.totalorder %s1427_s24, 1  ;;  %s1427_s24 = sphi %s1487_s24, %s17_s24  }
   0x2   : > { %p237_p1 = scmp.lt.s32.totalorder %s1427_s24, 3 }
   0x4   : > { %p238_p2 = pnand %p1182_p0, %p237_p1 }
   0x5   : > { %p269_p3 = scmp.lt.s32.totalorder (!%p238_p2), %s1178_s25, 1  ;;  %s1429_s30 = smov (!%p238_p2), 126   ;;  %v1437_v7 = vmov (!%p238_p2), 0.0   ;;  %vm320_vm0 = vcmask (!%p238_p2), 883712   ;;  %vm308_vm1 = vcmask (!%p238_p2), 1031168   ;;  %vm296_vm2 = vcmask (!%p238_p2), 1039360  }
   0x6   : > { %241 = sbr.rel (%p238_p2) target bundleno = 1816 (0x718), region = 48  ;;  %s1430_s8 = smov (!%p238_p2), 127   ;;  %1228 = vmatprep.subr.bf16.mxu1 (!%p238_p2), %v1437_v7  ;;  %vm368_vm3 = vcmask (!%p238_p2), 711680   ;;  %vm356_vm4 = vcmask (!%p238_p2), 719872   ;;  %vm380_vm5 = vcmask (!%p238_p2), 703488   ;;  %vm344_vm6 = vcmask (!%p238_p2), 867328  }
   0x7   : > { %s1431_s9 = smov (!%p238_p2), 108   ;;  %s1432_s10 = smov (!%p238_p2), 106   ;;  %vm332_vm7 = vcmask (!%p238_p2), 875520   ;;  %vm1439_vm8 = vmmov (!%p238_p2), 0   ;;  %vm479_vm9 = vcmask (!%p238_p2), 1043456   ;;  %vm475_vm10 = vcmask (!%p238_p2), 588800  }
   0x8   : > { %s1433_s11 = smov (!%p238_p2), 107   ;;  %s1434_s12 = smov (!%p238_p2), 87   ;;  %1238 = vmatprep.mubr.msk.bf16.mxu1 (!%p238_p2), %vm1439_vm8, %v1437_v7  ;;  %vm598_vm11 = vcmask (!%p238_p2), 343040   ;;  %vm605_vm12 = vcmask (!%p238_p2), 834560   ;;  %vm1446_vm14 = vmmov (!%p238_p2), 1  }
   0x9   : > { %s1435_s13 = smov (!%p238_p2), 88   ;;  %s1436_s14 = smov (!%p238_p2), 86   ;;  %vm1190_vm13 = vmneg (!%p238_p2), %vm598_vm11 }
   0xa   : > { %s1440_s21 = smov (!%p238_p2), 42   ;;  %s1441_s22 = smov (!%p238_p2), 124   ;;  %vm1196_vm15 = vmpackc.low (!%p238_p2), %vm1446_vm14, %vm605_vm12 }
   0xb   : > { %s1442_s23 = smov (!%p238_p2), 48   ;;  %s1444_s27 = smov (!%p238_p2), 46  }
   0xc   : > { %s1445_s28 = smov (!%p238_p2), 44  }
   0xd   : > { %s1764_s25 = smov (!%p269_p3, %s1178_s25), 1 }
   0xe   : > { %s1209_s26 = sshll.u32 %s1764_s25, 4  ;;  %s1272_s18 = smul.u32 24, %s1764_s25 }
   0xf   : > { %s273_s29 = scalar_lea.vmem %s1755_s0, %s1209_s26  ;;  %s1443_s26 = smov 84  }
  0x10   : > { %v281_v0 = vld [vmem:[%s273_s29] sm:$0xff]  ;;  %v282_v1 = vld [vmem:[%s273_s29 + $0x8] sm:$0xf] }
  0x11   : > { %v1501_v2 = vunpack.c.h.bf16 %v281_v0  ;;  %v285_v3 = vunpack.c.l.bf16 %v282_v1  ;;  %v1505_v5 = vunpack.c.l.bf16 %v281_v0 }
  0x13   : > { %v1304_v4 = vpack.i.bf16 %v285_v3, %v1501_v2  ;;  %v1334_v6 = vpack.i.bf16 %v1501_v2, %v1505_v5 }
  0x15   : > { %1305 = vrot.lane.b32.xlu1 %v1304_v4, %s1429_s30  ;;  %1300 = vrot.lane.b32.xlu0 %v1304_v4, %s1430_s8 }
  0x19   : > { %1310 = vrot.lane.b32.xlu1 %v1304_v4, %s1431_s9  ;;  %290 = vrot.lane.b32.xlu0 %v1505_v5, %s1430_s8 }
  0x1d   : > { %314 = vrot.lane.b32.xlu1 %v1505_v5, %s1431_s9  ;;  %302 = vrot.lane.b32.xlu0 %v1505_v5, %s1429_s30 }
  0x21   : > { %1320 = vrot.lane.b32.xlu1 %v1304_v4, %s1432_s10  ;;  %1315 = vrot.lane.b32.xlu0 %v1304_v4, %s1433_s11 }
  0x25   : > { %338 = vrot.lane.b32.xlu1 %v1505_v5, %s1432_s10  ;;  %326 = vrot.lane.b32.xlu0 %v1505_v5, %s1433_s11 }
  0x29   : > { %1330 = vrot.lane.b32.xlu1 %v1304_v4, %s1434_s12  ;;  %1325 = vrot.lane.b32.xlu0 %v1304_v4, %s1435_s13 }
  0x2d   : > { %362 = vrot.lane.b32.xlu1 %v1505_v5, %s1434_s12  ;;  %350 = vrot.lane.b32.xlu0 %v1505_v5, %s1435_s13 }
  0x31   : > { %1335 = vrot.lane.b32.xlu0 %v1334_v6, %s1436_s14  ;;  %378 = vrot.lane.b32.xlu1 %v285_v3, %s1436_s14 }
  0x87   : > { %v1306_v8 = vpop.permute.xlu1 %1305  ;;  %v1301_v9 = vpop.permute.xlu0 %1300 }
  0x88   : > { %v1303_v10 = vunpack.i.h.bf16 %v1301_v9  ;;  %v1308_v14 = vunpack.i.h.bf16 %v1306_v8  ;;  %v1307_v24 = vunpack.i.l.bf16 %v1306_v8  ;;  %v1302_v31 = vunpack.i.l.bf16 %v1301_v9  ;;  %v286_v8 = vld [vmem:[%s1761_s6] sm:$0xff] }
  0x8a   : > { %v389_v11 = vpack.c.bf16 %v1303_v10, %v285_v3  ;;  %v310_v29 = vsel %vm308_vm1, %v1307_v24, %v1308_v14  ;;  %v298_v44 = vsel %vm296_vm2, %v1302_v31, %v1303_v10 }
  0x8b   : > { %v1311_v12 = vpop.permute.xlu1 %1310  ;;  %v291_v13 = vpop.permute.xlu0 %290  ;;  %v388_v48 = vpack.c.bf16 %v298_v44, %v1501_v2 }
  0x8c   : > { %v1313_v15 = vunpack.i.h.bf16 %v1311_v12  ;;  %426 = vrot.lane.b32.xlu1 %v389_v11, %s1433_s11  ;;  %v1312_v19 = vunpack.i.l.bf16 %v1311_v12  ;;  %v297_v47 = vsel %vm296_vm2, %v291_v13, %v1302_v31  ;;  %vm1191_vm2 = vmpackc.low %vm1446_vm14, %vm1190_vm13  ;;  %vm677_vm13 = vcmask 392192  }
  0x8d   : > { %v387_v57 = vpack.c.bf16 %v297_v47, %v1505_v5  ;;  %v1438_v5 = vmov 0   ;;  %vm707_vm14 = vcmask 359424  }
  0x8e   : > { %v392_v16 = vpack.c.bf16 %v1313_v15, %v1308_v14  ;;  %v322_v28 = vsel %vm320_vm0, %v1312_v19, %v1313_v15  ;;  %521 = vmatprep.mubr.bf16.mxu0 %v1438_v5  ;;  %1339 = vset.pattern.permute.xlu1 %v1438_v5 }
  0x8f   : > { %v315_v17 = vpop.permute.xlu1 %314  ;;  %v303_v18 = vpop.permute.xlu0 %302  ;;  %v391_v30 = vpack.c.bf16 %v322_v28, %v310_v29  ;;  %1400 = vset.pattern.permute.xlu0 %v1438_v5 }
  0x90   : > { %432 = vrot.lane.b32.xlu0 %v392_v16, %s1433_s11  ;;  %v321_v32 = vsel %vm320_vm0, %v315_v17, %v1312_v19  ;;  %v309_v33 = vsel %vm308_vm1, %v303_v18, %v1307_v24  ;;  %vm628_vm0 = vcmask 1014784  }
  0x91   : > { %v390_v40 = vpack.c.bf16 %v321_v32, %v309_v33 }
  0x93   : > { %v1526_v20 = vpop.permute.xlu1 %1320  ;;  %v1528_v21 = vpop.permute.xlu0 %1315 }
  0x94   : > { %v1323_v22 = vunpack.i.h.bf16 %v1526_v20  ;;  %v1318_v23 = vunpack.i.h.bf16 %v1528_v21  ;;  %v1322_v50 = vunpack.i.l.bf16 %v1526_v20  ;;  %v1317_v51 = vunpack.i.l.bf16 %v1528_v21 }
  0x96   : > { %v395_v25 = vpack.c.bf16 %v1323_v22, %v1318_v23  ;;  %v334_v60 = vsel %vm332_vm7, %v1317_v51, %v1318_v23  ;;  %v346_v61 = vsel %vm344_vm6, %v1322_v50, %v1323_v22 }
  0x97   : > { %v339_v26 = vpop.permute.xlu1 %338  ;;  %v327_v27 = vpop.permute.xlu0 %326  ;;  %v394_v0 = vpack.c.bf16 %v346_v61, %v334_v60 }
  0x98   : > { %438 = vrot.lane.b32.xlu1 %v395_v25, %s1433_s11  ;;  %v345_v1 = vsel %vm344_vm6, %v339_v26, %v1322_v50  ;;  %v333_v2 = vsel %vm332_vm7, %v327_v27, %v1317_v51  ;;  %vm692_vm6 = vcmask 375808  }
  0x99   : > { %v393_v4 = vpack.c.bf16 %v345_v1, %v333_v2 }
  0x9b   : > { %v1331_v34 = vpop.permute.xlu1 %1330  ;;  %v1326_v35 = vpop.permute.xlu0 %1325 }
  0x9c   : > { %v1333_v36 = vunpack.i.h.bf16 %v1331_v34  ;;  %v1332_v37 = vunpack.i.l.bf16 %v1331_v34  ;;  %v1328_v38 = vunpack.i.h.bf16 %v1326_v35  ;;  %v1327_v39 = vunpack.i.l.bf16 %v1326_v35  ;;  %430 = vrot.lane.b32.xlu1 %v391_v30, %s1433_s11 }
  0x9e   : > { %v398_v41 = vpack.c.bf16 %v1333_v36, %v1328_v38  ;;  %v358_v45 = vsel %vm356_vm4, %v1327_v39, %v1328_v38  ;;  %v370_v46 = vsel %vm368_vm3, %v1332_v37, %v1333_v36  ;;  %v571_v38 = vlaneseq }
  0x9f   : > { %v363_v42 = vpop.permute.xlu1 %362  ;;  %v351_v43 = vpop.permute.xlu0 %350  ;;  %v397_v49 = vpack.c.bf16 %v370_v46, %v358_v45 }
  0xa0   : > { %444 = vrot.lane.b32.xlu0 %v398_v41, %s1433_s11  ;;  %428 = vrot.lane.b32.xlu1 %v390_v40, %s1433_s11  ;;  %v369_v52 = vsel %vm368_vm3, %v363_v42, %v1332_v37  ;;  %v357_v53 = vsel %vm356_vm4, %v351_v43, %v1327_v39  ;;  %v386_v37 = vld [vmem:[%s1757_s2] sm:$0xf]  ;;  %v572_v39 = vshrl.u32 %v571_v38, 7  ;;  %vm662_vm3 = vcmask 687104  }
  0xa1   : > { %v396_v58 = vpack.c.bf16 %v369_v52, %v357_v53  ;;  %v280_v41 = vld [vmem:[%s1756_s1] sm:$0x7] }
  0xa2   : > { %v581_v40 = vsub.s32 2, %v572_v39  ;;  %v573_v42 = vsub.s32 0, %v572_v39  ;;  %v577_v43 = vsub.s32 1, %v572_v39 }
  0xa3   : > { %v1336_v54 = vpop.permute.xlu0 %1335  ;;  %v379_v55 = vpop.permute.xlu1 %378 }
  0xa4   : > { %424 = vrot.lane.b32.xlu0 %v388_v48, %s1433_s11  ;;  %442 = vrot.lane.b32.xlu1 %v397_v49, %s1433_s11  ;;  %v1338_v56 = vunpack.i.h.bf16 %v1336_v54  ;;  %v1337_v63 = vunpack.i.l.bf16 %v1336_v54  ;;  %v401_v9 = vpack.c.bf16 %v379_v55, %v379_v55  ;;  %v1598_v45 = vrot.slane %v280_v41, %v581_v40 }
  0xa5   : > { %v1600_v46 = vrot.slane %v280_v41, %v573_v42  ;;  %v1602_v50 = vrot.slane %v280_v41, %v577_v43 }
  0xa6   : > { %v382_v59 = vsel %vm380_vm5, %v1338_v56, %v379_v55  ;;  %v381_v3 = vsel %vm380_vm5, %v1337_v63, %v1338_v56 }
  0xa7   : > { %v400_v62 = vpack.c.bf16 %v382_v59, %v382_v59  ;;  %v399_v6 = vpack.c.bf16 %v381_v3, %v381_v3 }
  0xa8   : > { %422 = vrot.lane.b32.xlu0 %v387_v57, %s1433_s11  ;;  %440 = vrot.lane.b32.xlu1 %v396_v58, %s1433_s11 }
  0xac   : > { %436 = vrot.lane.b32.xlu0 %v394_v0, %s1433_s11  ;;  %448 = vrot.lane.b32.xlu1 %v400_v62, %s1433_s11 }
  0xb0   : > { %434 = vrot.lane.b32.xlu0 %v393_v4, %s1433_s11  ;;  %404 = vperm.xlu1 %1339, %v286_v8  }
  0xb4   : > { %446 = vrot.lane.b32.xlu0 %v399_v6, %s1433_s11 }
  0xb8   : > { %450 = vrot.lane.b32.xlu0 %v401_v9, %s1433_s11 }
  0xfe   : > { %v427_v10 = vpop.permute.xlu1 %426 }
  0xff   : > { %1229 = vmatpush3.bf16.msra.mxu1 %v427_v10 }
 0x100   : > { %1230 = vmatprep.subr.bf16.mxu1 %v1437_v7 }
 0x102   : > { %v433_v11 = vpop.permute.xlu0 %432 }
 0x103   : > { %1231 = vmatpush3.bf16.msra.mxu1 %v433_v11 }
 0x104   : > { %1232 = vmatprep.subr.bf16.mxu1 %v1437_v7 }
 0x10a   : > { %v439_v12 = vpop.permute.xlu1 %438 }
 0x10b   : > { %1233 = vmatpush3.bf16.msra.mxu1 %v439_v12 }
 0x10c   : > { %1234 = vmatprep.subr.bf16.mxu1 %v1437_v7 }
 0x10e   : > { %v431_v13 = vpop.permute.xlu1 %430 }
 0x10f   : > { %v456_v21 = vsel %vm332_vm7, %v431_v13, %v433_v11 }
 0x112   : > { %v445_v14 = vpop.permute.xlu0 %444  ;;  %v429_v15 = vpop.permute.xlu1 %428 }
 0x113   : > { %1235 = vmatpush3.bf16.msra.mxu1 %v445_v14  ;;  %v455_v23 = vsel %vm332_vm7, %v429_v15, %v431_v13  ;;  %v1189_v13 = vld [vmem:[%s1761_s6 + $0x8] sm:$0xff] }
 0x114   : > { %1236 = vmatprep.subr.bf16.mxu1 %v1437_v7 }
 0x116   : > { %v425_v16 = vpop.permute.xlu0 %424  ;;  %v443_v20 = vpop.permute.xlu1 %442 }
 0x117   : > { %v454_v17 = vsel %vm332_vm7, %v425_v16, %v427_v10  ;;  %v460_v28 = vsel %vm332_vm7, %v443_v20, %v445_v14 }
 0x118   : > { %489 = vmatprep.subr.bf16.mxu0 %v454_v17 }
 0x11a   : > { %v423_v18 = vpop.permute.xlu0 %422  ;;  %v441_v25 = vpop.permute.xlu1 %440 }
 0x11b   : > { %v453_v19 = vsel %vm332_vm7, %v423_v18, %v425_v16  ;;  %v459_v31 = vsel %vm332_vm7, %v441_v25, %v443_v20 }
 0x11c   : > { %490 = vmatpush1.bf16.msra.mxu0 %v453_v19 }
 0x11d   : > { %491 = vmatprep.subr.bf16.mxu0 %v456_v21 }
 0x11e   : > { %v437_v22 = vpop.permute.xlu0 %436  ;;  %v449_v29 = vpop.permute.xlu1 %448 }
 0x11f   : > { %v458_v24 = vsel %vm332_vm7, %v437_v22, %v439_v12 }
 0x120   : > { %492 = vmatpush1.bf16.msra.mxu0 %v455_v23 }
 0x121   : > { %493 = vmatprep.subr.bf16.mxu0 %v458_v24 }
 0x122   : > { %v435_v26 = vpop.permute.xlu0 %434 }
 0x123   : > { %v457_v27 = vsel %vm332_vm7, %v435_v26, %v437_v22 }
 0x124   : > { %494 = vmatpush1.bf16.msra.mxu0 %v457_v27 }
 0x125   : > { %495 = vmatprep.subr.bf16.mxu0 %v460_v28 }
 0x126   : > { %v447_v30 = vpop.permute.xlu0 %446 }
 0x127   : > { %v461_v32 = vsel %vm332_vm7, %v447_v30, %v449_v29 }
 0x128   : > { %496 = vmatpush1.bf16.msra.mxu0 %v459_v31  ;;  %v481_v36 = vsel %vm479_vm9, %v461_v32, 0 }
 0x12a   : > { %v451_v33 = vpop.permute.xlu0 %450 }
 0x12b   : > { %v462_v34 = vsel %vm332_vm7, %v449_v29, %v451_v33  ;;  %v487_v35 = vsel %vm479_vm9, %v451_v33, 0 }
 0x12c   : > { %1186 = vmatprep.subr.msk.bf16.mxu0 %vm479_vm9, %v462_v34  ;;  %1237 = vmatpush3.bf16.msra.mxu1 %v487_v35 }
 0x12d   : > { %498 = vmatpush1.bf16.msra.mxu0 %v481_v36  ;;  %1242 = vmatprep.subr.bf16.mxu1 %v1437_v7 }
 0x12f   : > { %1239 = vmatmul.mubr.msk.bf16.vlgmr.msra.gmra.mrb[0].mxu1 %vm475_vm10, %v386_v37  ;;  %v405_v44 = vpop.permute.xlu1 %404 }
 0x130   : > { %1187 = vmatmul.mubr.msk.bf16.vlgmr.msra.gmra.mrb[0].mxu0 %vm475_vm10, %v386_v37  ;;  %1252 = vmatprep.mubr.msk.bf16.mxu1 %vm1439_vm8, %v1437_v7 }
 0x131   : > { %779 = vmatprep.mubr.bf16.mxu0 %v1438_v5 }
 0x202   : > { %v564_v47 = vpop.f32.mrb[0].mxu1 }
 0x203   : > { %v523_v48 = vpop.f32.mrb[0].mxu0  ;;  %v565_v49 = vadd.f32 %v564_v47, %v405_v44  ;;  %v1240_v51 = vpop.f32.mrb[1].mxu1 }
 0x204   : > { %v524_v52 = vadd.f32 %v523_v48, %v405_v44  ;;  %v525_v53 = vpop.f32.mrb[1].mxu0  ;;  %v567_v54 = vpop.f32.mrb[2].mxu1 }
 0x205   : > { %v1605_v55 = vmul.f32 %v1598_v45, %v565_v49  ;;  %v526_v56 = vadd.f32 %v525_v53, %v405_v44  ;;  %v527_v57 = vpop.f32.mrb[2].mxu0  ;;  %v1241_v58 = vpop.f32.mrb[3].mxu1 }
 0x206   : > { %v1608_v59 = vmul.f32 %v1600_v46, %v524_v52  ;;  %v528_v60 = vpop.f32.mrb[3].mxu0 }
 0x207   : > { %v1611_v61 = vmul.f32 %v1602_v50, %v526_v56 }
 0x208   : > { %592 = vrot.lane.b32.xlu1 %v1608_v59, %s1440_s21 }
 0x209   : > { %v1340_v62 = vpack.i.bf16 %v1605_v55, %v1611_v61 }
 0x20b   : > { %1341 = vrot.lane.b32.xlu0 %v1340_v62, %s1440_s21 }
 0x27a   : > { %v1618_v63 = vpop.permute.xlu1 %592 }
 0x27b   : > { %v604_v0 = vsel %vm598_vm11, 0.0, %v1618_v63 }
 0x27c   : > { %622 = vrot.lane.b32.xlu0 %v604_v0, %s1441_s22  ;;  %611 = vrot.lane.b32.xlu1 %v604_v0, %s1429_s30  ;;  %v1345_v6 = vpack.i.bf16 %v1437_v7, %v604_v0 }
 0x27d   : > { %v1342_v1 = vpop.permute.xlu0 %1341 }
 0x27e   : > { %v1344_v2 = vunpack.i.h.bf16 %v1342_v1  ;;  %v1343_v3 = vunpack.i.l.bf16 %v1342_v1 }
 0x280   : > { %v600_v4 = vsel %vm598_vm11, %v1343_v3, %v1344_v2  ;;  %645 = vrot.lane.b32.xlu0 %v604_v0, %s1436_s14  ;;  %634 = vrot.lane.b32.xlu1 %v604_v0, %s1435_s13  ;;  %v599_v8 = vsel %vm598_vm11, %v1618_v63, %v1343_v3 }
 0x281   : > { %v606_v9 = vsel %vm605_vm12, %v600_v4, 0.0  ;;  %v1385_v12 = vpack.i.bf16 %v599_v8, %v604_v0 }
 0x282   : > { %v1355_v10 = vpack.i.bf16 %v606_v9, %v599_v8  ;;  %v1395_v11 = vpack.i.bf16 %v1437_v7, %v606_v9 }
 0x284   : > { %1346 = vrot.lane.b32.xlu0 %v1345_v6, %s1442_s23  ;;  %656 = vrot.lane.b32.xlu1 %v604_v0, %s1443_s26 }
 0x288   : > { %1351 = vrot.lane.b32.xlu1 %v1345_v6, %s1444_s27  ;;  %1356 = vrot.lane.b32.xlu0 %v1355_v10, %s1429_s30 }
 0x28c   : > { %1366 = vrot.lane.b32.xlu1 %v1355_v10, %s1435_s13  ;;  %1361 = vrot.lane.b32.xlu0 %v1355_v10, %s1441_s22 }
 0x290   : > { %1376 = vrot.lane.b32.xlu1 %v1355_v10, %s1443_s26  ;;  %1371 = vrot.lane.b32.xlu0 %v1355_v10, %s1436_s14 }
 0x294   : > { %1391 = vrot.lane.b32.xlu1 %v1355_v10, %s1444_s27  ;;  %1381 = vrot.lane.b32.xlu0 %v1355_v10, %s1442_s23 }
 0x298   : > { %1396 = vrot.lane.b32.xlu1 %v1395_v11, %s1445_s28  ;;  %1386 = vrot.lane.b32.xlu0 %v1385_v12, %s1445_s28 }
 0x29c   : > { %732 = vperm.xlu0 %1400, %v1189_v13  }
 0x2ee   : > { %v623_v14 = vpop.permute.xlu0 %622  ;;  %v612_v15 = vpop.permute.xlu1 %611 }
 0x2f2   : > { %v646_v16 = vpop.permute.xlu0 %645  ;;  %v635_v17 = vpop.permute.xlu1 %634 }
 0x2f6   : > { %v1637_v18 = vpop.permute.xlu0 %1346  ;;  %v657_v19 = vpop.permute.xlu1 %656 }
 0x2f7   : > { %v1349_v49 = vunpack.i.h.bf16 %v1637_v18  ;;  %v1348_v51 = vunpack.i.l.bf16 %v1637_v18 }
 0x2fa   : > { %v1639_v20 = vpop.permute.xlu1 %1351  ;;  %v1357_v21 = vpop.permute.xlu0 %1356 }
 0x2fb   : > { %v1359_v22 = vunpack.i.h.bf16 %v1357_v21  ;;  %v1358_v23 = vunpack.i.l.bf16 %v1357_v21  ;;  %v1354_v58 = vunpack.i.h.bf16 %v1639_v20  ;;  %v1353_v60 = vunpack.i.l.bf16 %v1639_v20 }
 0x2fd   : > { %v1197_v24 = vpack.c.bf16 %v1359_v22, %v600_v4  ;;  %v617_v25 = vsel %vm308_vm1, %v612_v15, %v1358_v23  ;;  %v618_v26 = vsel %vm308_vm1, %v1358_v23, %v1359_v22 }
 0x2fe   : > { %v1192_v27 = vpack.c.bf16 %v617_v25, %v1618_v63  ;;  %v1367_v28 = vpop.permute.xlu1 %1366  ;;  %v1362_v29 = vpop.permute.xlu0 %1361  ;;  %v716_v30 = vpack.c.bf16 %v618_v26, %v599_v8 }
 0x2ff   : > { %v1369_v31 = vunpack.i.h.bf16 %v1367_v28  ;;  %v1368_v32 = vunpack.i.l.bf16 %v1367_v28  ;;  %v1364_v33 = vunpack.i.h.bf16 %v1362_v29  ;;  %v1363_v34 = vunpack.i.l.bf16 %v1362_v29  ;;  %1243 = vmatpush3.bf16.msk.msra.mxu1 %vm1196_vm15, %v1197_v24 }
 0x300   : > { %747 = vmatprep.subr.bf16.mxu0 %v716_v30  ;;  %1244 = vmatprep.subr.bf16.mxu1 %v1437_v7 }
 0x301   : > { %v640_v35 = vsel %vm356_vm4, %v635_v17, %v1368_v32  ;;  %v720_v36 = vpack.c.bf16 %v1369_v31, %v1364_v33  ;;  %v629_v37 = vsel %vm628_vm0, %v623_v14, %v1363_v34  ;;  %1193 = vmatpush1.bf16.msk.msra.mxu0 %vm1191_vm2, %v1192_v27  ;;  %v630_v38 = vsel %vm628_vm0, %v1363_v34, %v1364_v33 }
 0x302   : > { %v718_v39 = vpack.c.bf16 %v640_v35, %v629_v37  ;;  %v1377_v40 = vpop.permute.xlu1 %1376  ;;  %v1372_v41 = vpop.permute.xlu0 %1371  ;;  %v641_v42 = vsel %vm356_vm4, %v1368_v32, %v1369_v31  ;;  %v714_v32 = vld [vmem:[%s1758_s3] sm:$0xf] }
 0x303   : > { %v1379_v43 = vunpack.i.h.bf16 %v1377_v40  ;;  %v1378_v44 = vunpack.i.l.bf16 %v1377_v40  ;;  %v1374_v47 = vunpack.i.h.bf16 %v1372_v41  ;;  %v1373_v48 = vunpack.i.l.bf16 %v1372_v41  ;;  %1245 = vmatpush3.bf16.msra.mxu1 %v720_v36 }
 0x304   : > { %v719_v52 = vpack.c.bf16 %v641_v42, %v630_v38  ;;  %1246 = vmatprep.subr.bf16.mxu1 %v1437_v7 }
 0x305   : > { %v663_v53 = vsel %vm662_vm3, %v657_v19, %v1378_v44  ;;  %v723_v54 = vpack.c.bf16 %v1379_v43, %v1374_v47  ;;  %v651_v56 = vsel %vm380_vm5, %v646_v16, %v1373_v48  ;;  %v652_v57 = vsel %vm380_vm5, %v1373_v48, %v1374_v47 }
 0x306   : > { %v721_v62 = vpack.c.bf16 %v663_v53, %v651_v56  ;;  %749 = vmatprep.subr.bf16.mxu0 %v719_v52  ;;  %v1392_v63 = vpop.permute.xlu1 %1391  ;;  %v1382_v0 = vpop.permute.xlu0 %1381  ;;  %v664_v1 = vsel %vm662_vm3, %v1378_v44, %v1379_v43 }
 0x307   : > { %750 = vmatpush1.bf16.msra.mxu0 %v718_v39  ;;  %v1394_v2 = vunpack.i.h.bf16 %v1392_v63  ;;  %v1393_v3 = vunpack.i.l.bf16 %v1392_v63  ;;  %v1384_v4 = vunpack.i.h.bf16 %v1382_v0  ;;  %v1383_v6 = vunpack.i.l.bf16 %v1382_v0  ;;  %1247 = vmatpush3.bf16.msra.mxu1 %v723_v54 }
 0x308   : > { %v722_v8 = vpack.c.bf16 %v664_v1, %v652_v57  ;;  %1248 = vmatprep.subr.bf16.mxu1 %v1437_v7 }
 0x309   : > { %v695_v9 = vsel %vm692_vm6, %v1394_v2, %v1354_v58  ;;  %v693_v10 = vsel %vm692_vm6, %v1353_v60, %v1393_v3  ;;  %v680_v11 = vsel %vm677_vm13, %v1384_v4, %v1349_v49  ;;  %v678_v12 = vsel %vm677_vm13, %v1348_v51, %v1383_v6 }
 0x30a   : > { %v726_v13 = vpack.c.bf16 %v695_v9, %v680_v11  ;;  %v724_v14 = vpack.c.bf16 %v693_v10, %v678_v12  ;;  %751 = vmatprep.subr.bf16.mxu0 %v722_v8  ;;  %v1397_v15 = vpop.permute.xlu1 %1396  ;;  %v1387_v16 = vpop.permute.xlu0 %1386  ;;  %v679_v17 = vsel %vm677_vm13, %v1383_v6, %v1384_v4  ;;  %v694_v18 = vsel %vm692_vm6, %v1393_v3, %v1394_v2 }
 0x30b   : > { %752 = vmatpush1.bf16.msra.mxu0 %v721_v62  ;;  %v1399_v19 = vunpack.i.h.bf16 %v1397_v15  ;;  %v1398_v20 = vunpack.i.l.bf16 %v1397_v15  ;;  %v1389_v21 = vunpack.i.h.bf16 %v1387_v16  ;;  %v1388_v22 = vunpack.i.l.bf16 %v1387_v16 }
 0x30c   : > { %v725_v23 = vpack.c.bf16 %v694_v18, %v679_v17  ;;  %1249 = vmatpush3.bf16.msra.mxu1 %v726_v13 }
 0x30d   : > { %v709_v24 = vsel %vm707_vm14, %v1389_v21, %v1398_v20  ;;  %1250 = vmatprep.subr.bf16.mxu1 %v1437_v7  ;;  %v708_v25 = vsel %vm707_vm14, %v1388_v22, %v1389_v21  ;;  %v710_v26 = vsel %vm707_vm14, %v1398_v20, %v1399_v19 }
 0x30e   : > { %v728_v27 = vpack.c.bf16 %v709_v24, %v709_v24  ;;  %753 = vmatprep.subr.bf16.mxu0 %v725_v23  ;;  %v727_v28 = vpack.c.bf16 %v708_v25, %v708_v25  ;;  %v729_v29 = vpack.c.bf16 %v710_v26, %v710_v26  ;;  %v1203_v23 = vld [vmem:[%s1761_s6 + $0x18] sm:$0xff]  ;;  %v1200_v24 = vld [vmem:[%s1761_s6 + $0x10] sm:$0xff] }
 0x30f   : > { %754 = vmatpush1.bf16.msra.mxu0 %v724_v14 }
 0x310   : > { %1194 = vmatprep.subr.msk.bf16.mxu0 %vm479_vm9, %v728_v27  ;;  %v739_v30 = vsel %vm479_vm9, %v727_v28, 0  ;;  %v745_v31 = vsel %vm479_vm9, %v729_v29, 0 }
 0x311   : > { %1251 = vmatpush3.bf16.msra.mxu1 %v745_v31 }
 0x312   : > { %1256 = vmatprep.subr.bf16.mxu1 %v1437_v7 }
 0x313   : > { %756 = vmatpush1.bf16.msra.mxu0 %v739_v30 }
 0x314   : > { %1253 = vmatmul.mubr.msk.bf16.vlgmr.msra.gmra.mrb[4].mxu1 %vm475_vm10, %v714_v32 }
 0x315   : > { %1260 = vmatprep.mubr.msk.bf16.mxu1 %vm1439_vm8, %v1437_v7 }
 0x316   : > { %1195 = vmatmul.mubr.msk.bf16.vlgmr.msra.gmra.mrb[4].mxu0 %vm475_vm10, %v714_v32 }
 0x317   : > { %960 = vmatprep.mubr.bf16.mxu0 %v1438_v5 }
 0x31b   : > { %v733_v33 = vpop.permute.xlu0 %732 }
 0x3e7   : > { %v822_v34 = vpop.f32.mrb[4].mxu1 }
 0x3e8   : > { %v823_v35 = vadd.f32 %v822_v34, %v733_v33  ;;  %v1254_v36 = vpop.f32.mrb[5].mxu1 }
 0x3e9   : > { %v781_v37 = vpop.f32.mrb[4].mxu0  ;;  %v825_v38 = vpop.f32.mrb[6].mxu1 }
 0x3ea   : > { %v783_v39 = vpop.f32.mrb[5].mxu0  ;;  %v1255_v40 = vpop.f32.mrb[7].mxu1  ;;  %v1682_v41 = vmul.f32 %v823_v35, %v1598_v45  ;;  %v782_v48 = vadd.f32 %v781_v37, %v733_v33  ;;  %v884_v35 = vld [vmem:[%s1759_s4] sm:$0xf] }
 0x3eb   : > { %v784_v42 = vadd.f32 %v783_v39, %v733_v33  ;;  %v785_v43 = vpop.f32.mrb[6].mxu0 }
 0x3ec   : > { %v786_v44 = vpop.f32.mrb[7].mxu0  ;;  %v1691_v51 = vmul.f32 %v782_v48, %v1600_v46  ;;  %v1011_v37 = vpack.c.bf16 %v1682_v41, %v1605_v55 }
 0x3ed   : > { %v1685_v47 = vmul.f32 %v784_v42, %v1602_v50 }
 0x3ee   : > { %v1009_v38 = vpack.c.bf16 %v1691_v51, %v1608_v59 }
 0x3ef   : > { %v1401_v49 = vpack.i.bf16 %v1682_v41, %v1685_v47  ;;  %v1010_v36 = vpack.c.bf16 %v1685_v47, %v1611_v61 }
 0x3f1   : > { %1402 = vrot.lane.b32.xlu1 %v1401_v49, %s1440_s21 }
 0x3f5   : > { %834 = vrot.lane.b32.xlu1 %v1691_v51, %s1440_s21  ;;  %s278_s21 = scalar_lea.vmem %s1762_s7, %s1272_s18 }
 0x463   : > { %v1403_v45 = vpop.permute.xlu1 %1402 }
 0x464   : > { %v1405_v52 = vunpack.i.h.bf16 %v1403_v45  ;;  %v1404_v53 = vunpack.i.l.bf16 %v1403_v45 }
 0x466   : > { %v841_v54 = vsel %vm598_vm11, %v1404_v53, %v1405_v52 }
 0x467   : > { %v846_v50 = vsel %vm605_vm12, %v841_v54, 0.0  ;;  %v835_v56 = vpop.permute.xlu1 %834 }
 0x468   : > { %v840_v57 = vsel %vm598_vm11, %v835_v56, %v1404_v53  ;;  %v845_v58 = vsel %vm598_vm11, 0.0, %v835_v56 }
 0x469   : > { %851 = vrot.lane.b32.xlu1 %v845_v58, %s1429_s30  ;;  %v1406_v60 = vpack.i.bf16 %v846_v50, %v840_v57 }
 0x46b   : > { %1407 = vrot.lane.b32.xlu0 %v1406_v60, %s1429_s30 }
 0x46d   : > { %1417 = vrot.lane.b32.xlu1 %v1406_v60, %s1436_s14 }
 0x46f   : > { %1412 = vrot.lane.b32.xlu0 %v1406_v60, %s1435_s13 }
 0x471   : > { %873 = vrot.lane.b32.xlu1 %v845_v58, %s1436_s14 }
 0x473   : > { %862 = vrot.lane.b32.xlu0 %v845_v58, %s1435_s13 }
 0x4db   : > { %v852_v46 = vpop.permute.xlu1 %851 }
 0x4dd   : > { %v1408_v62 = vpop.permute.xlu0 %1407 }
 0x4de   : > { %v1410_v63 = vunpack.i.h.bf16 %v1408_v62  ;;  %v1409_v0 = vunpack.i.l.bf16 %v1408_v62 }
 0x4df   : > { %v1418_v1 = vpop.permute.xlu1 %1417 }
 0x4e0   : > { %v887_v2 = vpack.c.bf16 %v1410_v63, %v846_v50  ;;  %v1420_v3 = vunpack.i.h.bf16 %v1418_v1  ;;  %v1419_v4 = vunpack.i.l.bf16 %v1418_v1  ;;  %v857_v6 = vsel %vm308_vm1, %v852_v46, %v1409_v0 }
 0x4e1   : > { %v1413_v8 = vpop.permute.xlu0 %1412  ;;  %v885_v9 = vpack.c.bf16 %v857_v6, %v845_v58  ;;  %v858_v12 = vsel %vm308_vm1, %v1409_v0, %v1410_v63  ;;  %vm924_vm1 = vcmask 261120  }
 0x4e2   : > { %v1415_v10 = vunpack.i.h.bf16 %v1413_v8  ;;  %v1414_v11 = vunpack.i.l.bf16 %v1413_v8  ;;  %906 = vrot.lane.b32.xlu1 %v887_v2, %s1433_s11  ;;  %v880_v14 = vsel %vm380_vm5, %v1419_v4, %v1420_v3  ;;  %v886_v18 = vpack.c.bf16 %v858_v12, %v840_v57 }
 0x4e3   : > { %902 = vrot.lane.b32.xlu0 %v885_v9, %s1433_s11  ;;  %v874_v15 = vpop.permute.xlu1 %873 }
 0x4e4   : > { %v869_v13 = vsel %vm356_vm4, %v1414_v11, %v1415_v10  ;;  %v879_v20 = vsel %vm380_vm5, %v874_v15, %v1419_v4  ;;  %v890_v21 = vpack.c.bf16 %v1420_v3, %v1415_v10  ;;  %vm1117_vm5 = vcmask 490496  }
 0x4e5   : > { %v863_v16 = vpop.permute.xlu0 %862  ;;  %v889_v17 = vpack.c.bf16 %v880_v14, %v869_v13 }
 0x4e6   : > { %v868_v19 = vsel %vm356_vm4, %v863_v16, %v1414_v11  ;;  %vm1023_vm4 = vcmask 195584  }
 0x4e7   : > { %910 = vrot.lane.b32.xlu1 %v889_v17, %s1433_s11  ;;  %904 = vrot.lane.b32.xlu0 %v886_v18, %s1433_s11  ;;  %v888_v22 = vpack.c.bf16 %v879_v20, %v868_v19 }
 0x4eb   : > { %908 = vrot.lane.b32.xlu1 %v888_v22, %s1433_s11  ;;  %912 = vrot.lane.b32.xlu0 %v890_v21, %s1433_s11 }
 0x4ef   : > { %1020 = vperm.xlu1 %1339, %v1203_v23   ;;  %893 = vperm.xlu0 %1400, %v1200_v24  }
 0x554   : > { %v907_v25 = vpop.permute.xlu1 %906 }
 0x555   : > { %1257 = vmatpush3.bf16.msra.mxu1 %v907_v25  ;;  %v903_v26 = vpop.permute.xlu0 %902 }
 0x556   : > { %1258 = vmatprep.subr.bf16.mxu1 %v1437_v7 }
 0x559   : > { %v911_v27 = vpop.permute.xlu1 %910  ;;  %v905_v28 = vpop.permute.xlu0 %904 }
 0x55a   : > { %v914_v29 = vsel %vm332_vm7, %v903_v26, %v905_v28  ;;  %v915_v30 = vsel %vm332_vm7, %v905_v28, %v907_v25 }
 0x55b   : > { %928 = vmatprep.subr.bf16.mxu0 %v915_v30 }
 0x55c   : > { %929 = vmatpush1.bf16.msra.mxu0 %v914_v29 }
 0x55d   : > { %v909_v31 = vpop.permute.xlu1 %908  ;;  %v913_v32 = vpop.permute.xlu0 %912 }
 0x55e   : > { %v916_v33 = vsel %vm332_vm7, %v909_v31, %v911_v27  ;;  %1259 = vmatpush3.bf16.msra.mxu1 %v913_v32  ;;  %v917_v34 = vsel %vm332_vm7, %v911_v27, %v913_v32  ;;  %vm1121_vm7 = vcmask 523264  }
 0x55f   : > { %930 = vmatprep.subr.bf16.mxu0 %v917_v34  ;;  %1264 = vmatprep.subr.bf16.mxu1 %v1437_v7 }
 0x560   : > { %931 = vmatpush1.bf16.msra.mxu0 %v916_v33 }
 0x561   : > { %1261 = vmatmul.mubr.msk.bf16.vlgmr.msra.gmra.mrb[8].mxu1 %vm924_vm1, %v884_v35  ;;  %1036 = vmatprep.subr.bf16.mxu0 %v1010_v36 }
 0x562   : > { %1265 = vmatpush3.bf16.msra.mxu1 %v1011_v37  ;;  %1268 = vmatprep.mubr.msk.bf16.mxu1 %vm1439_vm8, %v1437_v7 }
 0x563   : > { %1201 = vmatmul.mubr.msk.bf16.vlgmr.msra.gmra.mrb[8].mxu0 %vm924_vm1, %v884_v35  ;;  %1266 = vmatprep.subr.bf16.mxu1 %v1437_v7 }
 0x564   : > { %1037 = vmatpush1.bf16.msra.mxu0 %v1009_v38  ;;  %1068 = vmatprep.mubr.bf16.mxu0 %v1438_v5  ;;  %v1015_v5 = vld [vmem:[%s1760_s5] sm:$0xf] }
 0x56e   : > { %v894_v61 = vpop.permute.xlu0 %893  ;;  %v1021_v54 = vpop.permute.xlu1 %1020 }
 0x634   : > { %v1003_v39 = vpop.f32.mrb[8].mxu1 }
 0x635   : > { %v1004_v40 = vadd.f32 %v1003_v39, %v894_v61  ;;  %v1262_v55 = vpop.f32.mrb[9].mxu1 }
 0x636   : > { %v962_v41 = vpop.f32.mrb[8].mxu0  ;;  %v1006_v42 = vpop.f32.mrb[10].mxu1 }
 0x637   : > { %v1014_v43 = vpack.c.bf16 %v1004_v40, %v1004_v40  ;;  %v963_v44 = vadd.f32 %v962_v41, %v894_v61  ;;  %v964_v47 = vpop.f32.mrb[9].mxu0  ;;  %v1263_v59 = vpop.f32.mrb[11].mxu1 }
 0x638   : > { %v965_v48 = vadd.f32 %v964_v47, %v894_v61  ;;  %v966_v49 = vpop.f32.mrb[10].mxu0 }
 0x639   : > { %v1034_v51 = vsel %vm479_vm9, %v1014_v43, 0  ;;  %v1012_v45 = vpack.c.bf16 %v963_v44, %v963_v44  ;;  %v967_v7 = vpop.f32.mrb[11].mxu0 }
 0x63a   : > { %v1013_v52 = vpack.c.bf16 %v965_v48, %v965_v48  ;;  %1267 = vmatpush3.bf16.msra.mxu1 %v1034_v51 }
 0x63b   : > { %v1028_v53 = vsel %vm479_vm9, %v1012_v45, 0 }
 0x63c   : > { %1204 = vmatprep.subr.msk.bf16.mxu0 %vm479_vm9, %v1013_v52 }
 0x63d   : > { %1039 = vmatpush1.bf16.msra.mxu0 %v1028_v53  ;;  %1269 = vmatmul.mubr.msk.bf16.vlgmr.msra.gmra.mrb[12].mxu1 %vm1023_vm4, %v1015_v5 }
 0x640   : > { %1205 = vmatmul.mubr.msk.bf16.vlgmr.msra.gmra.mrb[12].mxu0 %vm1023_vm4, %v1015_v5 }
 0x710   : > { %v1111_v50 = vpop.f32.mrb[12].mxu1 }
 0x711   : > { %v1112_v56 = vadd.f32 %v1111_v50, %v1021_v54  ;;  %v1270_v57 = vpop.f32.mrb[13].mxu1 }
 0x712   : > { %v1114_v58 = vpop.f32.mrb[14].mxu1 }
 0x713   : > { %v1118_v60 = vsel %vm1117_vm5, %v1112_v56, 0.0  ;;  %v1070_v46 = vpop.f32.mrb[12].mxu0  ;;  %v1271_v62 = vpop.f32.mrb[15].mxu1 }
 0x714   : > { %1122 = vst.msk [vmem:[%s278_s21 + $0x10] sm:$0xff] %vm1121_vm7, %v1118_v60  ;;  %v1071_v63 = vadd.f32 %v1070_v46, %v1021_v54  ;;  %v1072_v0 = vpop.f32.mrb[13].mxu0 }
 0x715   : > { %v1073_v1 = vadd.f32 %v1072_v0, %v1021_v54  ;;  %v1074_v2 = vpop.f32.mrb[14].mxu0 }
 0x716   : > { %1119 = vst [vmem:[%s278_s21] sm:$0xff] %v1071_v63  ;;  %v1075_v3 = vpop.f32.mrb[15].mxu0 }
 0x717   : > { %1120 = vst [vmem:[%s278_s21 + $0x8] sm:$0xff] %v1073_v1 }
 0x718 PF: > { %s17_s24 = sadd.s32 1, %s1427_s24  }
 0x719   : > { %p14_p4 = scmp.ge.s32.totalorder %s17_s24, 4  }
 0x71b   :  { %16 = sbr.rel (!%p14_p4) target bundleno = 1 (0x1), region = 81 }

</bundles_post_ra>
